<compile_context>
chip_gen: v7x
topology: tpu7x:2x2x1
jax: 0.10.0
libtpu: 0.0.40
codegen_flags: <defaults>
</compile_context>

<pallas_src>
import jax
import jax.numpy as jnp
from jax.experimental import pallas as pl
from jax.experimental.pallas import tpu as pltpu


def _round_up(x, m):
    return (x + m - 1) // m * m


def _embed_kernel(x_ref, idx_ref, w_ref, b_ref, tab_ref, o_ref):
    # x_ref:   (TM, 2+C)  raw flattened-patch rows (index cols hit zero W rows)
    # idx_ref: (TM, 2)    int32 row/col indices
    # w_ref:   (2+C, Ep)  conv1d(k=1) weight (transposed), 2 zero rows on top
    # b_ref:   (1, Ep)    conv1d bias (zero-padded to Ep)
    # tab_ref: (2*NP, Ep) [row_table; col_table] (zero-padded to Ep)
    # o_ref:   (TM, Ep)
    tm = o_ref.shape[0]
    two_np = tab_ref.shape[0]
    num_patches = two_np // 2

    # Projection: (TM, 2+C) @ (2+C, Ep) on the MXU, f32 accumulation.
    proj = jnp.dot(x_ref[...], w_ref[...],
                   preferred_element_type=jnp.float32)
    proj = proj + b_ref[...].astype(jnp.float32)

    # Fused embedding lookup: one-hot matmul against the VMEM-resident
    # concatenated [row; col] table.  A single MXU dot produces
    # row_emb + col_emb, so no (B,S,E) gather tensors ever touch HBM.
    row = idx_ref[:, 0:1]                                      # (TM, 1)
    col = idx_ref[:, 1:2]                                      # (TM, 1)
    pos_iota = jax.lax.broadcasted_iota(jnp.int32, (tm, two_np), 1)
    onehot = jnp.logical_or(pos_iota == row,
                            pos_iota == col + num_patches)
    pos = jnp.dot(onehot.astype(tab_ref.dtype), tab_ref[...],
                  preferred_element_type=jnp.float32)

    o_ref[...] = (proj + pos).astype(o_ref.dtype)


def pix2struct_vision_embeddings(flattened_patches, proj_w, proj_b,
                                 row_table, col_table, *, tm=256):
    """flattened_patches: (B, S, 2 + C); columns 0/1 carry row/col indices.

    proj_w: (C, E)  (PyTorch Conv1d weight (E, C, 1), transposed + squeezed)
    proj_b: (E,)
    row_table, col_table: (num_patches, E)
    """
    # TODO(synk): optional `norm_layer` (LayerNorm on embeddings) is not
    # implemented; module default is norm_layer=None (no norm).
    B, S, cin = flattened_patches.shape
    E = proj_w.shape[1]
    NP = row_table.shape[0]
    out_dtype = flattened_patches.dtype

    M = B * S
    TM = min(tm, _round_up(M, 8))       # rows per grid step (sublane multiple)
    Mp = _round_up(M, TM)
    Ep = _round_up(E, 128)              # lane-dense output stores

    # ---- parameter packing (tiny constants, VMEM-resident in the kernel) --
    # Two zero rows on top of W: the raw (row_idx, col_idx, feats...) rows can
    # then be fed straight into the matmul without slicing feature columns.
    w_full = jnp.concatenate(
        [jnp.zeros((2, E), proj_w.dtype), proj_w], axis=0)      # (2+C, E)
    w_full = jnp.pad(w_full, ((0, 0), (0, Ep - E)))
    b_full = jnp.pad(proj_b.reshape(1, E), ((0, 0), (0, Ep - E)))
    tables = jnp.concatenate([row_table, col_table], axis=0)    # (2*NP, E)
    tables = jnp.pad(tables, ((0, 0), (0, Ep - E)))

    # ---- activations: flatten (B, S) -> M, extract int32 indices ----------
    x2d = flattened_patches.reshape(M, cin)
    idx = jnp.stack(
        [flattened_patches[:, :, 0].astype(jnp.int32),
         flattened_patches[:, :, 1].astype(jnp.int32)],
        axis=-1).reshape(M, 2)
    if Mp > M:
        x2d = jnp.pad(x2d, ((0, Mp - M), (0, 0)))
        idx = jnp.pad(idx, ((0, Mp - M), (0, 0)))

    out = pl.pallas_call(
        _embed_kernel,
        out_shape=jax.ShapeDtypeStruct((Mp, Ep), out_dtype),
        grid_spec=pltpu.PrefetchScalarGridSpec(
            num_scalar_prefetch=0,
            grid=(Mp // TM,),
            in_specs=[
                pl.BlockSpec((TM, cin), lambda m: (m, 0)),      # patch rows
                pl.BlockSpec((TM, 2), lambda m: (m, 0)),        # indices
                pl.BlockSpec((cin, Ep), lambda m: (0, 0)),      # weight (const)
                pl.BlockSpec((1, Ep), lambda m: (0, 0)),        # bias   (const)
                pl.BlockSpec((2 * NP, Ep), lambda m: (0, 0)),   # tables (const)
            ],
            out_specs=pl.BlockSpec((TM, Ep), lambda m: (m, 0)),
        ),
        compiler_params=pltpu.CompilerParams(
            dimension_semantics=("parallel",)),
    )(x2d, idx, w_full, b_full, tables)

    return out[:M, :E].reshape(B, S, E)


if __name__ == "__main__":
    # Small, deterministic config consistent with the module:
    #   img_size=(16,16), patch_size=4 -> patches_resolution=(4,4), num_patches=16
    #   in_chans (per-patch feature dim) = 6, embed_dim = 32
    B, S = 2, 8
    C, E = 6, 32
    NUM_PATCHES = 16

    key = jax.random.PRNGKey(0)
    k_feat, k_ridx, k_cidx, k_w, k_b, k_re, k_ce = jax.random.split(key, 7)

    # PyTorch Conv1d weight is (E, C, 1); we pass its transpose (C, E).
    proj_w = jax.random.normal(k_w, (C, E), jnp.float32) * 0.02
    proj_b = jax.random.normal(k_b, (E,), jnp.float32) * 0.02
    row_table = jax.random.normal(k_re, (NUM_PATCHES, E), jnp.float32) * 0.02
    col_table = jax.random.normal(k_ce, (NUM_PATCHES, E), jnp.float32) * 0.02

    feats = jax.random.normal(k_feat, (B, S, C), jnp.float32)
    row_idx = jax.random.randint(k_ridx, (B, S), 0, NUM_PATCHES)
    col_idx = jax.random.randint(k_cidx, (B, S), 0, NUM_PATCHES)
    flattened_patches = jnp.concatenate(
        [row_idx[..., None].astype(jnp.float32),
         col_idx[..., None].astype(jnp.float32),
         feats], axis=-1)                                       # (B, S, 2 + C)

    out = pix2struct_vision_embeddings(flattened_patches, proj_w, proj_b,
                                       row_table, col_table)
    out = jax.block_until_ready(out)

    # Pure-JAX reference.
    ref = (feats @ proj_w + proj_b
           + jnp.take(row_table, row_idx, axis=0)
           + jnp.take(col_table, col_idx, axis=0))
    assert out.shape == (B, S, E)
    err = float(jnp.max(jnp.abs(out - ref)))
    assert jnp.allclose(out, ref, atol=1e-5, rtol=1e-5), err

    print("KERNEL_OK")
</pallas_src>

<mosaic_0001>
module attributes {stable_mosaic.version = 11 : i64} {
  func.func @_embed_kernel(%arg0: i32, %arg1: memref<16x8xf32, #tpu.memory_space<vmem>>, %arg2: memref<16x2xi32, #tpu.memory_space<vmem>>, %arg3: memref<8x128xf32, #tpu.memory_space<vmem>>, %arg4: memref<1x128xf32, #tpu.memory_space<vmem>>, %arg5: memref<32x128xf32, #tpu.memory_space<vmem>>, %arg6: memref<16x128xf32, #tpu.memory_space<vmem>>) attributes {dimension_semantics = [#tpu.dimension_semantics<parallel>], iteration_bounds = array<i64: 1>, scalar_prefetch = 0 : i64, scratch_operands = 0 : i64, tpu.core_type = #tpu.core_type<tc>, window_params = [{transform_indices = @transform_0, window_bounds = array<i64: 16, 8>}, {transform_indices = @transform_1, window_bounds = array<i64: 16, 2>}, {pipeline_mode = #tpu.pipeline_mode<synchronous>, transform_indices = @transform_2, window_bounds = array<i64: 8, 128>}, {pipeline_mode = #tpu.pipeline_mode<synchronous>, transform_indices = @transform_3, window_bounds = array<i64: 1, 128>}, {pipeline_mode = #tpu.pipeline_mode<synchronous>, transform_indices = @transform_4, window_bounds = array<i64: 32, 128>}, {transform_indices = @transform_5, window_bounds = array<i64: 16, 128>}]} {
    %c0 = arith.constant 0 : index
    %c0_0 = arith.constant 0 : index
    %0 = vector.load %arg1[%c0, %c0_0] : memref<16x8xf32, #tpu.memory_space<vmem>>, vector<16x8xf32>
    %c0_1 = arith.constant 0 : index
    %c0_2 = arith.constant 0 : index
    %1 = vector.load %arg3[%c0_1, %c0_2] : memref<8x128xf32, #tpu.memory_space<vmem>>, vector<8x128xf32>
    %cst = arith.constant dense<0.000000e+00> : vector<16x128xf32>
    %2 = tpu.matmul %0, %1, %cst {dimension_numbers = #tpu.dot_dimension_numbers<[1], [0], [0], [1], [0, 0, 1, 1], [], []>} : vector<16x8xf32>, vector<8x128xf32>, vector<16x128xf32> -> vector<16x128xf32>
    %c0_3 = arith.constant 0 : index
    %c0_4 = arith.constant 0 : index
    %3 = vector.load %arg4[%c0_3, %c0_4] : memref<1x128xf32, #tpu.memory_space<vmem>>, vector<1x128xf32>
    %4 = vector.broadcast %3 : vector<1x128xf32> to vector<16x128xf32>
    %5 = arith.addf %2, %4 : vector<16x128xf32>
    %c0_5 = arith.constant 0 : index
    %c0_6 = arith.constant 0 : index
    %6 = vector.load %arg2[%c0_5, %c0_6] : memref<16x2xi32, #tpu.memory_space<vmem>>, vector<16x1xi32>
    %c0_7 = arith.constant 0 : index
    %c1 = arith.constant 1 : index
    %7 = vector.load %arg2[%c0_7, %c1] : memref<16x2xi32, #tpu.memory_space<vmem>>, vector<16x1xi32>
    %8 = tpu.iota {dimensions = array<i32: 1>} : vector<16x32xi32>
    %9 = vector.broadcast %6 : vector<16x1xi32> to vector<16x32xi32>
    %10 = arith.cmpi eq, %8, %9 : vector<16x32xi32>
    %c16_i32 = arith.constant 16 : i32
    %11 = vector.broadcast %c16_i32 : i32 to vector<16x1xi32>
    %12 = arith.addi %7, %11 : vector<16x1xi32>
    %13 = vector.broadcast %12 : vector<16x1xi32> to vector<16x32xi32>
    %14 = arith.cmpi eq, %8, %13 : vector<16x32xi32>
    %15 = arith.ori %10, %14 : vector<16x32xi1>
    %16 = arith.extui %15 : vector<16x32xi1> to vector<16x32xi32>
    %17 = arith.sitofp %16 : vector<16x32xi32> to vector<16x32xf32>
    %c0_8 = arith.constant 0 : index
    %c0_9 = arith.constant 0 : index
    %18 = vector.load %arg5[%c0_8, %c0_9] : memref<32x128xf32, #tpu.memory_space<vmem>>, vector<32x128xf32>
    %cst_10 = arith.constant dense<0.000000e+00> : vector<16x128xf32>
    %19 = tpu.matmul %17, %18, %cst_10 {dimension_numbers = #tpu.dot_dimension_numbers<[1], [0], [0], [1], [0, 0, 1, 1], [], []>} : vector<16x32xf32>, vector<32x128xf32>, vector<16x128xf32> -> vector<16x128xf32>
    %20 = arith.addf %5, %19 : vector<16x128xf32>
    %c0_11 = arith.constant 0 : index
    %c0_12 = arith.constant 0 : index
    %21 = vector.load %arg6[%c0_11, %c0_12] : memref<16x128xf32, #tpu.memory_space<vmem>>, vector<16x128xf32>
    tpu.vector_store %arg6[%c0_11, %c0_12], %20 {strides = array<i32>} : memref<16x128xf32, #tpu.memory_space<vmem>>, vector<16x128xf32>,
    return
  }
  func.func @transform_0(%arg0: i32) -> (i32, i32) {
    %c0_i32 = arith.constant 0 : i32
    %c0_i32_0 = arith.constant 0 : i32
    return %arg0, %c0_i32 : i32, i32
  }
  func.func @transform_1(%arg0: i32) -> (i32, i32) {
    %c0_i32 = arith.constant 0 : i32
    %c0_i32_0 = arith.constant 0 : i32
    return %arg0, %c0_i32 : i32, i32
  }
  func.func @transform_2(%arg0: i32) -> (i32, i32) {
    %c0_i32 = arith.constant 0 : i32
    %c0_i32_0 = arith.constant 0 : i32
    %c0_i32_1 = arith.constant 0 : i32
    return %c0_i32, %c0_i32_0 : i32, i32
  }
  func.func @transform_3(%arg0: i32) -> (i32, i32) {
    %c0_i32 = arith.constant 0 : i32
    %c0_i32_0 = arith.constant 0 : i32
    %c0_i32_1 = arith.constant 0 : i32
    return %c0_i32, %c0_i32_0 : i32, i32
  }
  func.func @transform_4(%arg0: i32) -> (i32, i32) {
    %c0_i32 = arith.constant 0 : i32
    %c0_i32_0 = arith.constant 0 : i32
    %c0_i32_1 = arith.constant 0 : i32
    return %c0_i32, %c0_i32_0 : i32, i32
  }
  func.func @transform_5(%arg0: i32) -> (i32, i32) {
    %c0_i32 = arith.constant 0 : i32
    %c0_i32_0 = arith.constant 0 : i32
    return %arg0, %c0_i32 : i32, i32
  }
}

</mosaic_0001>

<bundles_post_ra>
// kernel: tpu_custom_call.1
= control target key start
LH: loop header
LB: loop body
LE: loop exit
PB: predicated region body
PF: predicated region fallthrough
CT: control target
= control target key end

     0   :  { %v325_v3 = vmov 0   ;;  %s403_s0 = inlined_call_operand.vmem [shape: f32[16,8], index: 0, kind: input, shape index: {}]   ;;  %s404_s1 = inlined_call_operand.vmem [shape: s32[16,2], index: 1, kind: input, shape index: {}]   ;;  %s405_s2 = inlined_call_operand.vmem [shape: f32[8,128], index: 2, kind: input, shape index: {}]   ;;  %s406_s3 = inlined_call_operand.vmem [shape: f32[1,128], index: 3, kind: input, shape index: {}]   ;;  %s407_s4 = inlined_call_operand.vmem [shape: f32[32,128], index: 4, kind: input, shape index: {}]   ;;  %s408_s5 = inlined_call_operand.hbm [shape: f32[16,128], index: 5, kind: output, shape index: {}]  }
   0x1   :  { %v114_v0 = vld [vmem:[%s404_s1 + $0x8] sm:$0xff]  ;;  %v113_v1 = vld [vmem:[%s404_s1] sm:$0xff]  ;;  %299 = vset.pattern.permute.xlu1 %v325_v3  ;;  %297 = vset.pattern.permute.xlu0 %v325_v3 }
   0x2   :  { %v141_v2 = vld [vmem:[%s407_s4] sm:$0xff]  ;;  %v142_v4 = vld [vmem:[%s407_s4 + $0x8] sm:$0xff] }
   0x3   :  { %10 = vsyncpa [#allocation3], 0  ;;  %121 = vperm.xlu1 %299, %v114_v0   ;;  %118 = vperm.xlu0 %297, %v113_v1   ;;  %v279_v5 = vpack.c.bf16 %v142_v4, %v141_v2  ;;  %v126_v6 = vadd.s32 16, %v114_v0  ;;  %v125_v7 = vadd.s32 16, %v113_v1  ;;  %v143_v8 = vld [vmem:[%s407_s4 + $0x10] sm:$0xff]  ;;  %v144_v9 = vld [vmem:[%s407_s4 + $0x18] sm:$0xff]  ;;  %v115_v15 = vlaneseq }
   0x4   :  { %v23_v10 = vld [vmem:[%s405_s2] sm:$0xff]  ;;  %v283_v11 = vpack.c.bf16 %v144_v9, %v143_v8  ;;  %v326_v12 = vmov 1   ;;  %vm31_vm0 = vcmask 64512   ;;  %v22_v14 = vld [vmem:[%s403_s0 + $0x8] sm:$0xff]  ;;  %vm145_vm6 = vcmask 261120   ;;  %s328_s4 = smov [#allocation2]  }
   0x5   :  { %280 = vmatprep.subr.bf16.mxu0 %v279_v5  ;;  %v21_v13 = vld [vmem:[%s403_s0] sm:$0xff]  ;;  %263 = vmatprep.subr.mxu1 %v23_v10  ;;  %v116_v18 = vand.u32 127, %v115_v15  ;;  %v327_v21 = vmov 0.0   ;;  %s236_s10 = sshll.u32 %s328_s4, 4  ;;  %s237_s10 = int_to_ptr.vmem [resolvable:$true] %s236_s10 }
   0x6   :  { %282 = vmatpush3.bf16.msra.mxu0 %v279_v5  ;;  %265 = vmatprep.mubr.msk.f32.mxu1 %vm31_vm0, %v21_v13  ;;  %v247_v26 = vld [vmem:[%s406_s3] ss:$0 sm:$0xff]  ;;  %s301_s11 = scalar_lea.vmem %s237_s10, 256  ;;  %p306_p1 = scmp.lt.s32.totalorder %s237_s10, %s237_s10 }
   0x7   :  { %300 = vset.pattern.permute.xlu1 %v326_v12  ;;  %298 = vset.pattern.permute.xlu0 %v326_v12  ;;  %p302_p0 = scmp.ne.s32.totalorder %s237_s10, %s301_s11  ;;  %p307_p2 = scmp.lt.s32.totalorder %s301_s11, %s301_s11 }
   0x8   :  { %131 = vperm.xlu1 %300, %v126_v6   ;;  %128 = vperm.xlu0 %298, %v125_v7  }
   0x9   :  { %264 = vmatpush3.msra.mxu1 %v23_v10  ;;  %284 = vmatprep.subr.bf16.mxu0 %v283_v11  ;;  %p308_p3 = por %p307_p2, %p306_p1 }
   0xa   :  { %266 = vmatmul.mubr.msk.f32.vlgmr.msra.gmra.mrb[0].mxu1 %vm31_vm0, %v22_v14  ;;  %286 = vmatpush3.bf16.msra.mxu0 %v283_v11 }
   0xb   :  { %p309_p4 = pnand %p308_p3, %p302_p0 }
  0x82   :  { %v119_v16 = vpop.permute.xlu0 %118  ;;  %v122_v17 = vpop.permute.xlu1 %121 }
  0x83   :  { %vm124_vm1 = vcmp.eq.s32.totalorder %v116_v18, %v122_v17  ;;  %vm123_vm4 = vcmp.eq.s32.totalorder %v116_v18, %v119_v16 }
  0x87   :  { %v132_v19 = vpop.permute.xlu1 %131  ;;  %v129_v20 = vpop.permute.xlu0 %128 }
  0x88   :  { %vm134_vm2 = vcmp.eq.s32.totalorder %v116_v18, %v132_v19  ;;  %vm133_vm3 = vcmp.eq.s32.totalorder %v116_v18, %v129_v20 }
  0x89   :  { %vm136_vm5 = vmor %vm124_vm1, %vm134_vm2 }
  0x8a   :  { %vm135_vm7 = vmor %vm123_vm4, %vm133_vm3  ;;  %v251_v22 = vsel %vm136_vm5, 1.0, %v327_v21 }
  0x8b   :  { %v250_v23 = vsel %vm135_vm7, 1.0, %v327_v21 }
  0x8c   :  { %276 = vmatprep.mubr.msk.f32.mxu0 %vm145_vm6, %v250_v23 }
  0x8d   :  { %277 = vmatmul.mubr.msk.f32.vlgmr.msra.gmra.mrb[0].mxu0 %vm145_vm6, %v251_v22 }
  0xdd   :  { %v267_v24 = vpop.f32.mrb[0].mxu1 }
  0xde   :  { %v104_v25 = vpop.f32.mrb[1].mxu1  ;;  %v110_v27 = vadd.f32 %v267_v24, %v247_v26 }
  0xdf   :  { %v105_v28 = vadd.f32 %v247_v26, %v104_v25 }
 0x160   :  { %v278_v29 = vpop.f32.mrb[0].mxu0 }
 0x161   :  { %v228_v30 = vadd.f32 %v278_v29, %v110_v27  ;;  %v218_v31 = vpop.f32.mrb[1].mxu0 }
 0x162   :  { %v227_v32 = vadd.f32 %v218_v31, %v105_v28 }
 0x163   :  { %230 = vst [vmem:[#allocation2 + $0x8] sm:$0xff] %v228_v30 }
 0x164   :  { %229 = vst [vmem:[#allocation2] sm:$0xff] %v227_v32 }
 0x165   :  { %312 = shalt.err (!%p309_p4)
}
 0x166   :  { %s313_s13 = scalar_lea.hbm %s408_s5, 256 }
 0x167   :  { %p314_p5 = scmp.ne.s32.totalorder %s408_s5, %s313_s13  ;;  %p317_p6 = scmp.lt.u32.totalorder %s313_s13, %s408_s5 }
 0x169   :  { %p319_p7 = pnand %p317_p6, %p314_p5 }
 0x16b   :  { %322 = shalt.err (!%p319_p7)
}
 0x16c   :  { %s329_s18 = smov 128   ;;  %s330_s19 = smov 8  }
 0x16d   :  { %242 = dma.vmem_to_hbm [thread:$0]  %s237_s10, 256, %s408_s5, [#allocation3], %s329_s18, %s329_s18, %s330_s19  }
 0x16e   :  { %323 = dma.done.wait [#allocation3], 256  }
 0x16f   :  { %324 = vsyncadd [#allocation3], 4294967040 }
 0x170   :  { %246 = vsyncpa [#allocation3], 1 }

</bundles_post_ra>
